<compile_context>
chip_gen: v7x
topology: tpu7x:2x2x1
jax: 0.10.0
libtpu: 0.0.40
codegen_flags: <defaults>
</compile_context>

<pallas_src>
import jax
import jax.numpy as jnp
from jax.experimental import pallas as pl
from jax.experimental.pallas import tpu as pltpu


def _noise_injection_kernel(w_ref, x_ref, n_ref, o_ref):
    # w_ref: (1, C, 1)   x_ref / o_ref: (Bt, C, T)   n_ref: (Bt, 1, T)
    # out = image + weight * noise, weight broadcast over batch & space,
    # noise broadcast over channels.  Pure VPU work, no relayouts.
    o_ref[...] = x_ref[...] + w_ref[...] * n_ref[...]


def _largest_divisor_tile(n, cap, quantum=128):
    """Largest divisor of n that is <= cap, preferring multiples of `quantum`."""
    if n <= cap:
        return n
    best = 0
    d = quantum
    while d <= cap:
        if n % d == 0:
            best = d
        d += quantum
    if best:
        return best
    for d in range(min(cap, n), 0, -1):
        if n % d == 0:
            return d
    return n


def noise_injection(image, noise, weight, *, vmem_budget_bytes=8 * 1024 * 1024):
    """image: (B, C, H, W), noise: (B, 1, H, W), weight: (1, C, 1, 1) or (C,)."""
    B, C, H, W = image.shape
    HW = H * W
    itemsize = jnp.dtype(image.dtype).itemsize

    # Free reshapes (contiguous memory): keep NCHW, put H*W on the lane axis.
    x = image.reshape(B, C, HW)
    nz = noise.reshape(B, 1, HW).astype(image.dtype)
    w = weight.reshape(1, C, 1).astype(image.dtype)

    # Spatial tile: keep x + out + noise blocks under the VMEM budget
    # (matters for large activations on v7x's 64 MiB VMEM), lane-aligned.
    bytes_per_hw_col = (2 * C + 1) * itemsize          # x + out + noise per column
    hw_tile = _largest_divisor_tile(
        HW, max(128, vmem_budget_bytes // bytes_per_hw_col))

    # Batch tile: fold several (small) images into one grid step to amortize
    # the per-grid-step overhead.
    bytes_per_image = bytes_per_hw_col * hw_tile
    bt = max(1, min(B, vmem_budget_bytes // max(bytes_per_image, 1)))
    while B % bt:
        bt -= 1

    grid = (B // bt, HW // hw_tile)

    block_bytes = bt * bytes_per_hw_col * hw_tile
    # Double-buffered inputs/output + headroom; explicit so the default scoped
    # limit (16 MiB on v5e / 32 MiB on v6e) never bites for large blocks.
    vmem_limit = min(128 * 1024 * 1024,
                     max(4 * 1024 * 1024, int(2.5 * block_bytes)))

    out = pl.pallas_call(
        _noise_injection_kernel,
        out_shape=jax.ShapeDtypeStruct((B, C, HW), image.dtype),
        grid=grid,
        in_specs=[
            pl.BlockSpec((1, C, 1), lambda b, s: (0, 0, 0)),           # weight
            pl.BlockSpec((bt, C, hw_tile), lambda b, s: (b, 0, s)),    # image
            pl.BlockSpec((bt, 1, hw_tile), lambda b, s: (b, 0, s)),    # noise
        ],
        out_specs=pl.BlockSpec((bt, C, hw_tile), lambda b, s: (b, 0, s)),
        compiler_params=pltpu.CompilerParams(
            dimension_semantics=("parallel", "parallel"),
            vmem_limit_bytes=vmem_limit,
        ),
    )(w, x, nz)

    return out.reshape(B, C, H, W)


def noise_injection_ref(image, noise, weight):
    """Pure-JAX mirror of the PyTorch forward (NCHW)."""
    return image + weight.reshape(1, -1, 1, 1) * noise


if __name__ == "__main__":
    B, C, H, W = 2, 4, 16, 16
    key = jax.random.PRNGKey(0)
    kx, kn, kw = jax.random.split(key, 3)

    image = jax.random.normal(kx, (B, C, H, W), jnp.float32)
    noise = jax.random.normal(kn, (B, 1, H, W), jnp.float32)
    # The module zero-initialises the weight; also test random values so the
    # noise path is actually exercised numerically.
    weight = jax.random.normal(kw, (1, C, 1, 1), jnp.float32)

    out = noise_injection(image, noise, weight)
    out = jax.block_until_ready(out)
    ref = noise_injection_ref(image, noise, weight)
    assert out.shape == (B, C, H, W), out.shape
    max_err = float(jnp.max(jnp.abs(out - ref)))
    assert jnp.allclose(out, ref, atol=1e-6, rtol=1e-6), max_err

    # Zero-init weight (the module's default): output must equal the input.
    out0 = jax.block_until_ready(
        noise_injection(image, noise, jnp.zeros((1, C, 1, 1), jnp.float32)))
    assert jnp.allclose(out0, image, atol=1e-6, rtol=1e-6)

    print("KERNEL_OK")
</pallas_src>

<mosaic_0001>
module attributes {stable_mosaic.version = 11 : i64} {
  func.func @_noise_injection_kernel(%arg0: i32, %arg1: i32, %arg2: memref<1x4x1xf32, #tpu.memory_space<vmem>>, %arg3: memref<2x4x256xf32, #tpu.memory_space<vmem>>, %arg4: memref<2x1x256xf32, #tpu.memory_space<vmem>>, %arg5: memref<2x4x256xf32, #tpu.memory_space<vmem>>) attributes {dimension_semantics = [#tpu.dimension_semantics<parallel>, #tpu.dimension_semantics<parallel>], iteration_bounds = array<i64: 1, 1>, scalar_prefetch = 0 : i64, scratch_operands = 0 : i64, tpu.core_type = #tpu.core_type<tc>, window_params = [{pipeline_mode = #tpu.pipeline_mode<synchronous>, transform_indices = @transform_0, window_bounds = array<i64: 1, 4, 1>}, {transform_indices = @transform_1, window_bounds = array<i64: 2, 4, 256>}, {transform_indices = @transform_2, window_bounds = array<i64: 2, 1, 256>}, {transform_indices = @transform_3, window_bounds = array<i64: 2, 4, 256>}]} {
    %c0 = arith.constant 0 : index
    %c0_0 = arith.constant 0 : index
    %c0_1 = arith.constant 0 : index
    %0 = vector.load %arg3[%c0, %c0_0, %c0_1] : memref<2x4x256xf32, #tpu.memory_space<vmem>>, vector<2x4x256xf32>
    %c0_2 = arith.constant 0 : index
    %c0_3 = arith.constant 0 : index
    %c0_4 = arith.constant 0 : index
    %1 = vector.load %arg2[%c0_2, %c0_3, %c0_4] : memref<1x4x1xf32, #tpu.memory_space<vmem>>, vector<1x4x1xf32>
    %c0_5 = arith.constant 0 : index
    %c0_6 = arith.constant 0 : index
    %c0_7 = arith.constant 0 : index
    %2 = vector.load %arg4[%c0_5, %c0_6, %c0_7] : memref<2x1x256xf32, #tpu.memory_space<vmem>>, vector<2x1x256xf32>
    %3 = vector.broadcast %1 : vector<1x4x1xf32> to vector<2x4x256xf32>
    %4 = vector.broadcast %2 : vector<2x1x256xf32> to vector<2x4x256xf32>
    %5 = arith.mulf %3, %4 : vector<2x4x256xf32>
    %6 = arith.addf %0, %5 : vector<2x4x256xf32>
    %c0_8 = arith.constant 0 : index
    %c0_9 = arith.constant 0 : index
    %c0_10 = arith.constant 0 : index
    %7 = vector.load %arg5[%c0_8, %c0_9, %c0_10] : memref<2x4x256xf32, #tpu.memory_space<vmem>>, vector<2x4x256xf32>
    tpu.vector_store %arg5[%c0_8, %c0_9, %c0_10], %6 {strides = array<i32>} : memref<2x4x256xf32, #tpu.memory_space<vmem>>, vector<2x4x256xf32>,
    return
  }
  func.func @transform_0(%arg0: i32, %arg1: i32) -> (i32, i32, i32) {
    %c0_i32 = arith.constant 0 : i32
    %c0_i32_0 = arith.constant 0 : i32
    %c0_i32_1 = arith.constant 0 : i32
    %c0_i32_2 = arith.constant 0 : i32
    return %c0_i32, %c0_i32_0, %c0_i32_1 : i32, i32, i32
  }
  func.func @transform_1(%arg0: i32, %arg1: i32) -> (i32, i32, i32) {
    %c0_i32 = arith.constant 0 : i32
    %c0_i32_0 = arith.constant 0 : i32
    return %arg0, %c0_i32, %arg1 : i32, i32, i32
  }
  func.func @transform_2(%arg0: i32, %arg1: i32) -> (i32, i32, i32) {
    %c0_i32 = arith.constant 0 : i32
    %c0_i32_0 = arith.constant 0 : i32
    return %arg0, %c0_i32, %arg1 : i32, i32, i32
  }
  func.func @transform_3(%arg0: i32, %arg1: i32) -> (i32, i32, i32) {
    %c0_i32 = arith.constant 0 : i32
    %c0_i32_0 = arith.constant 0 : i32
    return %arg0, %c0_i32, %arg1 : i32, i32, i32
  }
}

</mosaic_0001>

<bundles_post_ra>
// kernel: tpu_custom_call.1
= control target key start
LH: loop header
LB: loop body
LE: loop exit
PB: predicated region body
PF: predicated region fallthrough
CT: control target
= control target key end

     0   :  { %8 = vsyncpa [#allocation3], 0  ;;  %s212_s0 = inlined_call_operand.vmem [shape: f32[1,4,1], index: 0, kind: input, shape index: {}]   ;;  %s213_s1 = inlined_call_operand.hbm [shape: f32[2,4,256], index: 1, kind: input, shape index: {}]   ;;  %s214_s2 = inlined_call_operand.vmem [shape: f32[2,1,256], index: 2, kind: input, shape index: {}]   ;;  %s215_s3 = inlined_call_operand.hbm [shape: f32[2,4,256], index: 3, kind: output, shape index: {}]  }
   0x1   :  { %9 = vsyncpa [#allocation4], 0  ;;  %s148_s12 = smov [#allocation2]   ;;  %s100_s16 = scalar_lea.hbm %s213_s1, 256 }
   0x2   :  { %s17_s13 = sshll.u32 %s148_s12, 4  ;;  %p101_p0 = scmp.ne.s32.totalorder %s213_s1, %s100_s16  ;;  %s18_s13 = int_to_ptr.vmem [resolvable:$true] %s17_s13 }
   0x3   :  { %p104_p1 = scmp.lt.u32.totalorder %s100_s16, %s213_s1 }
   0x5   :  { %p106_p2 = pnand %p104_p1, %p101_p0 }
   0x7   :  { %109 = shalt.err (!%p106_p2)
}
   0x8   :  { %s110_s21 = scalar_lea.vmem %s18_s13, 256  ;;  %p115_p4 = scmp.lt.s32.totalorder %s18_s13, %s18_s13 }
   0x9   :  { %p111_p3 = scmp.ne.s32.totalorder %s18_s13, %s110_s21  ;;  %p116_p5 = scmp.lt.s32.totalorder %s110_s21, %s110_s21 }
   0xb   :  { %p117_p6 = por %p116_p5, %p115_p4 }
   0xd   :  { %p118_p7 = pnand %p117_p6, %p111_p3 }
   0xf   :  { %121 = shalt.err (!%p118_p7)
}
  0x10   :  { %s149_s22 = smov 128   ;;  %s150_s23 = smov 8  }
  0x11   :  { %23 = dma.hbm_to_vmem [thread:$0]  %s213_s1, 256, %s18_s13, [#allocation3], %s149_s22, %s149_s22, %s150_s23  }
  0x12   :  { %144 = dma.done.wait [#allocation3], 256  }
  0x13   :  { %145 = vsyncadd [#allocation3], 4294967040  ;;  %v151_v0 = vmov 0   ;;  %v31_v1 = vld [vmem:[%s212_s0] sm:$0xf]  ;;  %v41_v2 = vlaneseq  ;;  %v29_v17 = vld [vmem:[#allocation2] sm:$0xff] }
  0x14   :  { %99 = vset.pattern.permute.xlu0 %v151_v0  ;;  %v32_v6 = vld [vmem:[%s214_s2] sm:$0x3]  ;;  %v33_v7 = vld [vmem:[%s214_s2 + $0x2] sm:$0x3]  ;;  %v30_v18 = vld [vmem:[#allocation2 + $0x8] sm:$0xff]  ;;  %s152_s0 = smov [#allocation5]  }
  0x15   :  { %36 = vperm.xlu0 %99, %v31_v1   ;;  %v42_v3 = vshrl.u32 %v41_v2, 7  ;;  %s82_s1 = sshll.u32 %s152_s0, 4  ;;  %s83_s1 = int_to_ptr.vmem [resolvable:$true] %s82_s1 }
  0x16   :  { %s122_s2 = scalar_lea.vmem %s83_s1, 256  ;;  %p127_p9 = scmp.lt.s32.totalorder %s83_s1, %s83_s1 }
  0x17   :  { %v43_v4 = vsub.s32 0, %v42_v3  ;;  %v47_v5 = vsub.s32 1, %v42_v3  ;;  %p123_p8 = scmp.ne.s32.totalorder %s83_s1, %s122_s2  ;;  %p128_p10 = scmp.lt.s32.totalorder %s122_s2, %s122_s2 }
  0x19   :  { %v44_v8 = vrot.slane %v32_v6, %v43_v4  ;;  %v48_v9 = vrot.slane %v32_v6, %v47_v5  ;;  %v52_v10 = vrot.slane %v33_v7, %v43_v4  ;;  %v56_v11 = vrot.slane %v33_v7, %v47_v5  ;;  %p129_p11 = por %p128_p10, %p127_p9 }
  0x1b   :  { %p130_p12 = pnand %p129_p11, %p123_p8 }
  0x94   :  { %v37_v12 = vpop.permute.xlu0 %36 }
  0x95   :  { %v61_v13 = vmul.f32 %v44_v8, %v37_v12  ;;  %v62_v14 = vmul.f32 %v48_v9, %v37_v12  ;;  %v63_v15 = vmul.f32 %v52_v10, %v37_v12  ;;  %v64_v16 = vmul.f32 %v56_v11, %v37_v12 }
  0x97   :  { %v69_v19 = vcombine.low %v61_v13, %v62_v14  ;;  %v70_v20 = vcombine.low %v63_v15, %v64_v16 }
  0x99   :  { %v73_v21 = vadd.f32 %v69_v19, %v29_v17  ;;  %v74_v22 = vadd.f32 %v70_v20, %v30_v18 }
  0x9b   :  { %75 = vst [vmem:[#allocation5] sm:$0xff] %v73_v21  ;;  %76 = vst [vmem:[#allocation5 + $0x8] sm:$0xff] %v74_v22 }
  0x9c   :  { %133 = shalt.err (!%p130_p12)
}
  0x9d   :  { %s134_s7 = scalar_lea.hbm %s215_s3, 256 }
  0x9e   :  { %p135_p13 = scmp.ne.s32.totalorder %s215_s3, %s134_s7  ;;  %p138_p0 = scmp.lt.u32.totalorder %s134_s7, %s215_s3 }
  0xa0   :  { %p140_p1 = pnand %p138_p0, %p135_p13 }
  0xa2   :  { %143 = shalt.err (!%p140_p1)
}
  0xa3   :  { %88 = dma.vmem_to_hbm [thread:$0]  %s83_s1, 256, %s215_s3, [#allocation4], %s149_s22, %s149_s22, %s150_s23  }
  0xa4   :  { %146 = dma.done.wait [#allocation4], 256  }
  0xa5   :  { %147 = vsyncadd [#allocation4], 4294967040 }
  0xa6   :  { %92 = vsyncpa [#allocation3], 1 }
  0xa7   :  { %93 = vsyncpa [#allocation4], 1 }

</bundles_post_ra>
